<compile_context>
chip_gen: v5e
topology: v5e:2x2
jax: 0.10.0
libtpu: 0.0.40
codegen_flags: <defaults>
</compile_context>

<pallas_src>
import jax
import jax.numpy as jnp
from jax.experimental import pallas as pl
from jax.experimental.pallas import tpu as pltpu

OUT_PAD = 8            # padded final-layer width: full-array last dim -> legal block
DEFAULT_TILE_B = 4096  # batch rows per grid step (sweep 2048-8192 per generation)
_MIN_TILE = 8          # sublane multiple for f32 input/output tiles


def _round_up(x, m):
    return (x + m - 1) // m * m


def _choose_tile_b(batch, requested):
    """Pick a batch tile: multiple of 8, and >=2 grid steps when batch permits
    (v7x has 2 TensorCores; a 1-step grid leaves one idle)."""
    b_ceil = _round_up(batch, _MIN_TILE)
    tile = min(_round_up(max(int(requested), _MIN_TILE), _MIN_TILE), b_ceil)
    if b_ceil >= 2 * _MIN_TILE and b_ceil <= tile:
        tile = _round_up((b_ceil + 1) // 2, _MIN_TILE)
    tile = max(tile, _MIN_TILE)
    b_pad = _round_up(batch, tile)
    return tile, b_pad


def value_mlp_kernel(x_ref, w1_ref, b1_ref, w2_ref, b2_ref, w3_ref, b3_ref, o_ref):
    # State tile arrives in f32; cast to the matmul dtype in-kernel (VPU has
    # slack here and it halves state HBM traffic vs a wrapper-side cast pass).
    x = x_ref[...].astype(w1_ref.dtype)
    h1 = jnp.dot(x, w1_ref[...], preferred_element_type=jnp.float32) + b1_ref[...]
    h1 = jnp.maximum(h1, 0.0)
    h2 = jnp.dot(h1.astype(w2_ref.dtype), w2_ref[...],
                 preferred_element_type=jnp.float32) + b2_ref[...]
    h2 = jnp.maximum(h2, 0.0)
    v = jnp.dot(h2.astype(w3_ref.dtype), w3_ref[...],
                preferred_element_type=jnp.float32) + b3_ref[...]
    o_ref[...] = v.astype(o_ref.dtype)


def prepare_value_function_params(params, compute_dtype=jnp.bfloat16):
    """One-time param prep (cast + pad). Hoisted out of the per-call path.

    Weights -> compute_dtype (bf16 by default for native MXU rate); biases stay
    f32 (added to the f32 accumulator). W3/b3 are zero-padded from 1 to OUT_PAD
    output columns; the padded columns stay exactly zero and are dropped by the
    wrapper slice.
    """
    w1, b1, w2, b2, w3, b3 = params
    H = w1.shape[1]
    out_cols = w3.shape[1]  # == 1
    w3p = jnp.zeros((H, OUT_PAD), compute_dtype).at[:, :out_cols].set(
        w3.astype(compute_dtype))
    b3p = jnp.zeros((1, OUT_PAD), jnp.float32).at[:, :out_cols].set(
        b3.astype(jnp.float32))
    return (
        w1.astype(compute_dtype),
        b1.astype(jnp.float32),
        w2.astype(compute_dtype),
        b2.astype(jnp.float32),
        w3p,
        b3p,
    )


def value_function_forward(state, prepared_params, *, tile_b=DEFAULT_TILE_B):
    """state: (B, state_dim) float32, prepared_params from
    prepare_value_function_params -> (B,) float32."""
    w1c, b1c, w2c, b2c, w3c, b3c = prepared_params
    B, state_dim = state.shape
    H = w1c.shape[1]

    tile_b, b_pad = _choose_tile_b(B, tile_b)

    x = state
    if b_pad != B:
        # Explicit zero-pad for the ragged last tile (never rely on OOB reads).
        x = jnp.pad(x, ((0, b_pad - B), (0, 0)))

    grid = (b_pad // tile_b,)
    const = lambda i: (0, 0)  # weights/biases: same block every step -> VMEM resident
    # NOTE: pipeline_mode=pl.Buffered(1) on the constant specs would save the
    # redundant second buffer; negligible at H=256, consider it only for large H.

    flops = 2 * b_pad * (state_dim * H + H * H + H * OUT_PAD)
    bytes_accessed = (
        x.size * x.dtype.itemsize
        + sum(a.size * a.dtype.itemsize for a in (w1c, b1c, w2c, b2c, w3c, b3c))
        + b_pad * OUT_PAD * 4
    )

    out = pl.pallas_call(
        value_mlp_kernel,
        out_shape=jax.ShapeDtypeStruct((b_pad, OUT_PAD), jnp.float32),
        grid=grid,
        in_specs=[
            pl.BlockSpec((tile_b, state_dim), lambda i: (i, 0)),  # state tile (f32)
            pl.BlockSpec((state_dim, H), const),                  # W1
            pl.BlockSpec((1, H), const),                          # b1
            pl.BlockSpec((H, H), const),                          # W2
            pl.BlockSpec((1, H), const),                          # b2
            pl.BlockSpec((H, OUT_PAD), const),                    # W3 (8-col padded)
            pl.BlockSpec((1, OUT_PAD), const),                    # b3 (8-col padded)
        ],
        out_specs=pl.BlockSpec((tile_b, OUT_PAD), lambda i: (i, 0)),
        compiler_params=pltpu.CompilerParams(
            dimension_semantics=("parallel",),
            vmem_limit_bytes=48 * 1024 * 1024,  # safe under v7x's 64 MiB physical
        ),
        cost_estimate=pl.CostEstimate(
            flops=flops, transcendentals=0, bytes_accessed=bytes_accessed),
    )(x, w1c, b1c, w2c, b2c, w3c, b3c)

    # Squeeze(-1): keep column 0 only, drop batch padding.
    return out[:B, 0]


def init_value_function_params(key, state_dim, hidden_dim=256, n_hidden=2):
    """nn.Linear-style init for dims [state_dim, H, H, 1]; weights stored (in, out)."""
    assert n_hidden == 2, "kernel hardcodes 2 hidden layers (matches module default)"
    k1, k2, k3, k4, k5, k6 = jax.random.split(key, 6)

    def linear(kw, kb, fan_in, fan_out):
        bound = 1.0 / jnp.sqrt(fan_in)
        w = jax.random.uniform(kw, (fan_in, fan_out), jnp.float32, -bound, bound)
        b = jax.random.uniform(kb, (1, fan_out), jnp.float32, -bound, bound)
        return w, b

    w1, b1 = linear(k1, k2, state_dim, hidden_dim)
    w2, b2 = linear(k3, k4, hidden_dim, hidden_dim)
    w3, b3 = linear(k5, k6, hidden_dim, 1)
    return (w1, b1, w2, b2, w3, b3)


def value_function_ref(state, params):
    """Pure-JAX f32 reference for correctness check."""
    w1, b1, w2, b2, w3, b3 = params
    h = jnp.maximum(state @ w1 + b1, 0.0)
    h = jnp.maximum(h @ w2 + b2, 0.0)
    return (h @ w3 + b3)[:, 0]


if __name__ == "__main__":
    key = jax.random.PRNGKey(0)
    k_params, k_state = jax.random.split(key)

    batch = 8
    state_dim = 16
    hidden_dim = 32  # small hidden for the example (module default is 256)

    params = init_value_function_params(k_params, state_dim, hidden_dim, n_hidden=2)
    state = jax.random.normal(k_state, (batch, state_dim), jnp.float32)

    prepared = prepare_value_function_params(params)  # one-time cast/pad
    v = value_function_forward(state, prepared)
    v = jax.block_until_ready(v)

    v_ref = value_function_ref(state, params)
    assert v.shape == (batch,), f"expected shape ({batch},), got {v.shape}"
    # bf16 matmul operands with f32 accumulation -> relaxed tolerance vs f32 ref.
    assert jnp.allclose(v, v_ref, atol=5e-2, rtol=5e-2), (
        f"mismatch vs reference, max abs err {jnp.max(jnp.abs(v - v_ref))}")

    print("KERNEL_OK")
</pallas_src>

<mosaic_0001>
module attributes {stable_mosaic.version = 11 : i64} {
  func.func @value_mlp_kernel(%arg0: i32, %arg1: memref<8x16xf32, #tpu.memory_space<vmem>>, %arg2: memref<16x32xbf16, #tpu.memory_space<vmem>>, %arg3: memref<1x32xf32, #tpu.memory_space<vmem>>, %arg4: memref<32x32xbf16, #tpu.memory_space<vmem>>, %arg5: memref<1x32xf32, #tpu.memory_space<vmem>>, %arg6: memref<32x8xbf16, #tpu.memory_space<vmem>>, %arg7: memref<1x8xf32, #tpu.memory_space<vmem>>, %arg8: memref<8x8xf32, #tpu.memory_space<vmem>>) attributes {dimension_semantics = [#tpu.dimension_semantics<parallel>], iteration_bounds = array<i64: 1>, scalar_prefetch = 0 : i64, scratch_operands = 0 : i64, tpu.core_type = #tpu.core_type<tc>, window_params = [{transform_indices = @transform_0, window_bounds = array<i64: 8, 16>}, {pipeline_mode = #tpu.pipeline_mode<synchronous>, transform_indices = @transform_1, window_bounds = array<i64: 16, 32>}, {pipeline_mode = #tpu.pipeline_mode<synchronous>, transform_indices = @transform_2, window_bounds = array<i64: 1, 32>}, {pipeline_mode = #tpu.pipeline_mode<synchronous>, transform_indices = @transform_3, window_bounds = array<i64: 32, 32>}, {pipeline_mode = #tpu.pipeline_mode<synchronous>, transform_indices = @transform_4, window_bounds = array<i64: 1, 32>}, {pipeline_mode = #tpu.pipeline_mode<synchronous>, transform_indices = @transform_5, window_bounds = array<i64: 32, 8>}, {pipeline_mode = #tpu.pipeline_mode<synchronous>, transform_indices = @transform_6, window_bounds = array<i64: 1, 8>}, {transform_indices = @transform_7, window_bounds = array<i64: 8, 8>}]} {
    %c0 = arith.constant 0 : index
    %c0_0 = arith.constant 0 : index
    %0 = vector.load %arg1[%c0, %c0_0] : memref<8x16xf32, #tpu.memory_space<vmem>>, vector<8x16xf32>
    %1 = arith.truncf %0 : vector<8x16xf32> to vector<8x16xbf16>
    %c0_1 = arith.constant 0 : index
    %c0_2 = arith.constant 0 : index
    %2 = vector.load %arg2[%c0_1, %c0_2] : memref<16x32xbf16, #tpu.memory_space<vmem>>, vector<16x32xbf16>
    %cst = arith.constant dense<0.000000e+00> : vector<8x32xf32>
    %3 = tpu.matmul %1, %2, %cst {dimension_numbers = #tpu.dot_dimension_numbers<[1], [0], [0], [1], [0, 0, 1, 1], [], []>} : vector<8x16xbf16>, vector<16x32xbf16>, vector<8x32xf32> -> vector<8x32xf32>
    %c0_3 = arith.constant 0 : index
    %c0_4 = arith.constant 0 : index
    %4 = vector.load %arg3[%c0_3, %c0_4] : memref<1x32xf32, #tpu.memory_space<vmem>>, vector<1x32xf32>
    %5 = vector.broadcast %4 : vector<1x32xf32> to vector<8x32xf32>
    %6 = arith.addf %3, %5 : vector<8x32xf32>
    %cst_5 = arith.constant 0.000000e+00 : f32
    %7 = vector.broadcast %cst_5 : f32 to vector<8x32xf32>
    %8 = arith.maximumf %6, %7 : vector<8x32xf32>
    %9 = arith.truncf %8 : vector<8x32xf32> to vector<8x32xbf16>
    %c0_6 = arith.constant 0 : index
    %c0_7 = arith.constant 0 : index
    %10 = vector.load %arg4[%c0_6, %c0_7] : memref<32x32xbf16, #tpu.memory_space<vmem>>, vector<32x32xbf16>
    %cst_8 = arith.constant dense<0.000000e+00> : vector<8x32xf32>
    %11 = tpu.matmul %9, %10, %cst_8 {dimension_numbers = #tpu.dot_dimension_numbers<[1], [0], [0], [1], [0, 0, 1, 1], [], []>} : vector<8x32xbf16>, vector<32x32xbf16>, vector<8x32xf32> -> vector<8x32xf32>
    %c0_9 = arith.constant 0 : index
    %c0_10 = arith.constant 0 : index
    %12 = vector.load %arg5[%c0_9, %c0_10] : memref<1x32xf32, #tpu.memory_space<vmem>>, vector<1x32xf32>
    %13 = vector.broadcast %12 : vector<1x32xf32> to vector<8x32xf32>
    %14 = arith.addf %11, %13 : vector<8x32xf32>
    %cst_11 = arith.constant 0.000000e+00 : f32
    %15 = vector.broadcast %cst_11 : f32 to vector<8x32xf32>
    %16 = arith.maximumf %14, %15 : vector<8x32xf32>
    %17 = arith.truncf %16 : vector<8x32xf32> to vector<8x32xbf16>
    %c0_12 = arith.constant 0 : index
    %c0_13 = arith.constant 0 : index
    %18 = vector.load %arg6[%c0_12, %c0_13] : memref<32x8xbf16, #tpu.memory_space<vmem>>, vector<32x8xbf16>
    %cst_14 = arith.constant dense<0.000000e+00> : vector<8x8xf32>
    %19 = tpu.matmul %17, %18, %cst_14 {dimension_numbers = #tpu.dot_dimension_numbers<[1], [0], [0], [1], [0, 0, 1, 1], [], []>} : vector<8x32xbf16>, vector<32x8xbf16>, vector<8x8xf32> -> vector<8x8xf32>
    %c0_15 = arith.constant 0 : index
    %c0_16 = arith.constant 0 : index
    %20 = vector.load %arg7[%c0_15, %c0_16] : memref<1x8xf32, #tpu.memory_space<vmem>>, vector<1x8xf32>
    %21 = vector.broadcast %20 : vector<1x8xf32> to vector<8x8xf32>
    %22 = arith.addf %19, %21 : vector<8x8xf32>
    %c0_17 = arith.constant 0 : index
    %c0_18 = arith.constant 0 : index
    %23 = vector.load %arg8[%c0_17, %c0_18] : memref<8x8xf32, #tpu.memory_space<vmem>>, vector<8x8xf32>
    tpu.vector_store %arg8[%c0_17, %c0_18], %22 {strides = array<i32>} : memref<8x8xf32, #tpu.memory_space<vmem>>, vector<8x8xf32>,
    return
  }
  func.func @transform_0(%arg0: i32) -> (i32, i32) {
    %c0_i32 = arith.constant 0 : i32
    %c0_i32_0 = arith.constant 0 : i32
    return %arg0, %c0_i32 : i32, i32
  }
  func.func @transform_1(%arg0: i32) -> (i32, i32) {
    %c0_i32 = arith.constant 0 : i32
    %c0_i32_0 = arith.constant 0 : i32
    %c0_i32_1 = arith.constant 0 : i32
    return %c0_i32, %c0_i32_0 : i32, i32
  }
  func.func @transform_2(%arg0: i32) -> (i32, i32) {
    %c0_i32 = arith.constant 0 : i32
    %c0_i32_0 = arith.constant 0 : i32
    %c0_i32_1 = arith.constant 0 : i32
    return %c0_i32, %c0_i32_0 : i32, i32
  }
  func.func @transform_3(%arg0: i32) -> (i32, i32) {
    %c0_i32 = arith.constant 0 : i32
    %c0_i32_0 = arith.constant 0 : i32
    %c0_i32_1 = arith.constant 0 : i32
    return %c0_i32, %c0_i32_0 : i32, i32
  }
  func.func @transform_4(%arg0: i32) -> (i32, i32) {
    %c0_i32 = arith.constant 0 : i32
    %c0_i32_0 = arith.constant 0 : i32
    %c0_i32_1 = arith.constant 0 : i32
    return %c0_i32, %c0_i32_0 : i32, i32
  }
  func.func @transform_5(%arg0: i32) -> (i32, i32) {
    %c0_i32 = arith.constant 0 : i32
    %c0_i32_0 = arith.constant 0 : i32
    %c0_i32_1 = arith.constant 0 : i32
    return %c0_i32, %c0_i32_0 : i32, i32
  }
  func.func @transform_6(%arg0: i32) -> (i32, i32) {
    %c0_i32 = arith.constant 0 : i32
    %c0_i32_0 = arith.constant 0 : i32
    %c0_i32_1 = arith.constant 0 : i32
    return %c0_i32, %c0_i32_0 : i32, i32
  }
  func.func @transform_7(%arg0: i32) -> (i32, i32) {
    %c0_i32 = arith.constant 0 : i32
    %c0_i32_0 = arith.constant 0 : i32
    return %arg0, %c0_i32 : i32, i32
  }
}

</mosaic_0001>

<bundles_post_ra>
// kernel: tpu_custom_call.1
= control target key start
LH: loop header
LB: loop body
LE: loop exit
PB: predicated region body
PF: predicated region fallthrough
CT: control target
= control target key end

     0   :  { %12 = vsyncpa [#allocation3], 0  ;;  %s375_s0 = inlined_call_operand.hbm [shape: f32[8,16], index: 0, kind: input, shape index: {}]   ;;  %s376_s1 = inlined_call_operand.hbm [shape: bf16[16,32], index: 1, kind: input, shape index: {}]   ;;  %s377_s2 = inlined_call_operand.vmem [shape: f32[1,32], index: 2, kind: input, shape index: {}]   ;;  %s378_s3 = inlined_call_operand.vmem [shape: bf16[32,32], index: 3, kind: input, shape index: {}]   ;;  %s379_s4 = inlined_call_operand.vmem [shape: f32[1,32], index: 4, kind: input, shape index: {}]   ;;  %s380_s5 = inlined_call_operand.vmem [shape: bf16[32,8], index: 5, kind: input, shape index: {}]   ;;  %s381_s6 = inlined_call_operand.vmem [shape: f32[1,8], index: 6, kind: input, shape index: {}]   ;;  %s382_s7 = inlined_call_operand.hbm [shape: f32[8,8], index: 7, kind: output, shape index: {}]  }
   0x1   :  { %13 = vsyncpa [#allocation6], 0 }
   0x2   :  { %14 = vsyncpa [#allocation4], 0  ;;  %s20_s26 = sshll.u32 %s375_s0, 4  ;;  %s300_s27 = smov [#allocation2]   ;;  %s21_s26 = int_to_ptr.hbm [resolvable:$true] %s20_s26 }
   0x3   :  { %s22_s28 = sshll.u32 %s300_s27, 4  ;;  %s30_s8 = sshll.u32 %s376_s1, 4  ;;  %s23_s28 = int_to_ptr.vmem [resolvable:$true] %s22_s28  ;;  %s31_s8 = int_to_ptr.hbm [resolvable:$true] %s30_s8 }
   0x4   :  { %25 = dma.hbm_to_vmem [thread:$0]  %s21_s26, 128, %s23_s28, [#allocation3]  }
   0x5   :  { %s301_s9 = smov [#allocation5]   ;;  %s302_s11 = smov 64  }
   0x6   :  { %s32_s10 = sshll.u32 %s301_s9, 4  ;;  %s303_s12 = smov 4   ;;  %s33_s10 = int_to_ptr.vmem [resolvable:$true] %s32_s10 }
   0x7   :  { %38 = dma.hbm_to_vmem [thread:$0]  %s31_s8, 128, %s33_s10, [#allocation6], %s302_s11, %s302_s11, %s303_s12  }
   0x8   :  { %294 = dma.done.wait [#allocation3], 128  }
   0x9   :  { %295 = vsyncadd [#allocation3], 4294967168 }
   0xa   :  { %296 = dma.done.wait [#allocation6], 128  }
   0xb   :  { %297 = vsyncadd [#allocation6], 4294967168  ;;  %v209_v0 = vld [vmem:[#allocation5] sm:$0xff]  ;;  %v58_v1 = vld [vmem:[#allocation2] sm:$0xff]  ;;  %vm72_vm0 = vcmask 130048   ;;  %vm111_vm1 = vcmask 261120  }
   0xc   :  { %v59_v2 = vpack.c.bf16 %v58_v1, %v58_v1  ;;  %83 = vmatpush.bf16.msra.mxu0 %v209_v0  ;;  %v211_v3 = vld [vmem:[%s378_s3 + $0x8] sm:$0xff]  ;;  %v210_v4 = vld [vmem:[%s378_s3] sm:$0xff]  ;;  %s304_s23 = smov [#allocation7]   ;;  %vm166_vm2 = vcmask 64512  }
   0xd   :  { %121 = vmatpush.bf16.msra.mxu1 %v211_v3  ;;  %v219_v5 = vld [vmem:[%s377_s2] ss:$0 sm:$0xff]  ;;  %v213_v11 = vld [vmem:[%s380_s5 + $0x8] sm:$0xff]  ;;  %s173_s24 = sshll.u32 %s304_s23, 4  ;;  %s174_s24 = int_to_ptr.vmem [resolvable:$true] %s173_s24 }
   0xe   :  { %159 = vmatpush.bf16.msra.mxu2 %v213_v11  ;;  %v212_v12 = vld [vmem:[%s380_s5] sm:$0xff]  ;;  %s175_s5 = sshll.u32 %s382_s7, 4  ;;  %s176_s5 = int_to_ptr.hbm [resolvable:$true] %s175_s5 }
   0xf   :  { %190 = vmatmul.msk.bf16.vlgmr.msra.gmra.mxu0 %vm72_vm0, %v59_v2  ;;  %v220_v13 = vld [vmem:[%s379_s4] ss:$0 sm:$0xff] }
  0x10   :  { %v221_v19 = vld [vmem:[%s381_s6] ss:$0 sm:$0xff] }
  0x11   :  { %122 = vmatpush.bf16.msra.mxu1 %v210_v4 }
  0x12   :  { %160 = vmatpush.bf16.msra.mxu2 %v212_v12 }
  0x8c   :  { %v85_v6 = vpop.f32.mrf.mxu0 }
  0x8d   :  { %v86_v7 = vadd.f32 %v219_v5, %v85_v6 }
  0x8f   :  { %v89_v8 = vmax.f32 %v86_v7, 0.0 }
  0x91   :  { %v90_v9 = vpack.c.bf16 %v89_v8, %v89_v8 }
  0x93   :  { %199 = vmatmul.msk.bf16.vlgmr.msra.gmra.mxu1 %vm111_vm1, %v90_v9 }
  0x94   :  { %v87_v10 = vpop.f32.mrf.mxu0 }
 0x110   :  { %v124_v14 = vpop.f32.mrf.mxu1 }
 0x111   :  { %v125_v15 = vadd.f32 %v220_v13, %v124_v14 }
 0x113   :  { %v128_v16 = vmax.f32 %v125_v15, 0.0 }
 0x115   :  { %v129_v17 = vpack.c.bf16 %v128_v16, %v128_v16 }
 0x117   :  { %208 = vmatmul.msk.bf16.vlgmr.msra.gmra.mxu2 %vm111_vm1, %v129_v17 }
 0x118   :  { %v126_v18 = vpop.f32.mrf.mxu1 }
 0x19a   :  { %v162_v20 = vpop.f32.mrf.mxu2 }
 0x19b   :  { %v163_v21 = vadd.f32 %v221_v19, %v162_v20 }
 0x19d   :  { %167 = vst.msk [vmem:[#allocation7] sm:$0xff] %vm166_vm2, %v163_v21 }
 0x19e   :  { %178 = dma.vmem_to_hbm [thread:$0]  %s174_s24, 128, %s176_s5, [#allocation4]  }
 0x1a2   :  { %v164_v22 = vpop.f32.mrf.mxu2 }
 0x1a3   :  { %298 = dma.done.wait [#allocation4], 128  }
 0x1a4   :  { %299 = vsyncadd [#allocation4], 4294967168 }
 0x1a5   :  { %183 = vsyncpa [#allocation3], 1 }
 0x1a6   :  { %184 = vsyncpa [#allocation6], 1 }
 0x1a7   :  { %185 = vsyncpa [#allocation4], 1 }

</bundles_post_ra>
